<compile_context>
chip_gen: v7x
topology: tpu7x:2x2x1
jax: 0.10.0
libtpu: 0.0.40
codegen_flags: <defaults>
</compile_context>

<pallas_src>
import functools

import jax
import jax.numpy as jnp
from jax.experimental import pallas as pl
from jax.experimental.pallas import tpu as pltpu


# ---------------------------------------------------------------------------
# Kernel
# ---------------------------------------------------------------------------
def _ffn_kernel(x_ref, wgu_ref, wd_ref, o_ref, acc_ref, *, tn):
    # x_ref:   (tm, H)      token tile (activation dtype; bf16 in production)
    # wgu_ref: (H, 2*tn)    fused [gate | up] projection chunk (streams along I)
    # wd_ref:  (tn, H)      down-projection chunk (streams along I)
    # o_ref:   (tm, H)      output tile (written on the last I-chunk)
    # acc_ref: (tm, H)      f32 accumulator scratch, resident across the I axis
    j = pl.program_id(1)

    x = x_ref[...]
    # Single MXU pass for gate+up: x stays stationary across a 2x wider N.
    gu = jnp.dot(x, wgu_ref[...], preferred_element_type=jnp.float32)
    g = gu[:, :tn]          # lane-aligned static slices (tn is a multiple of 128)
    u = gu[:, tn:]
    # SiLU(g) * u in f32; exp + reciprocal run on the EUP slot.
    h = u * (g * pl.reciprocal(1.0 + jnp.exp(-g), approx=True))
    # Down-project this I-chunk (MXU, f32 accumulation).
    d = jnp.dot(h.astype(x_ref.dtype), wd_ref[...],
                preferred_element_type=jnp.float32)

    @pl.when(j == 0)
    def _first():
        # Write directly: saves a full (tm, H) f32 zero-store + reload per token tile.
        acc_ref[...] = d

    @pl.when(j > 0)
    def _accumulate():
        acc_ref[...] += d

    @pl.when(j == pl.num_programs(1) - 1)
    def _finalize():
        o_ref[...] = acc_ref[...].astype(o_ref.dtype)


# ---------------------------------------------------------------------------
# Tile / VMEM helpers
# ---------------------------------------------------------------------------
def _pick_tile(dim, preferred, align):
    """Largest multiple of `align` that divides `dim` and is <= `preferred`."""
    if dim <= preferred or dim % align != 0:
        return dim
    t = min(preferred, dim)
    t -= t % align
    while t > align and dim % t != 0:
        t -= align
    return t if (t > 0 and dim % t == 0) else dim


def _round_up(x, m):
    return ((x + m - 1) // m) * m


def _vmem_capacity_bytes():
    try:
        info = pltpu.get_tpu_info()
        cap = getattr(info, "vmem_capacity_bytes", None)
        if cap:
            return int(cap)
    except Exception:
        pass
    return 128 * 1024 * 1024  # v5e/v6e default


def _block_vmem_bytes(tm, tn, H, x_bytes, w_bytes):
    """Estimate of double-buffered block residency + accumulator."""
    return (2 * tm * H * x_bytes            # x tile
            + 2 * tm * H * x_bytes          # out tile
            + 2 * H * (2 * tn) * w_bytes    # fused [gate|up] chunk
            + 2 * tn * H * w_bytes          # down chunk
            + tm * H * 4)                   # f32 accumulator scratch


def _weight_spec(block_shape, index_map, depth):
    """Streamed-weight BlockSpec; depth > 2 requests deeper multi-buffering
    (helps DMA-exposed v6e prefill per the perf review)."""
    if depth is not None and depth > 2:
        try:
            return pl.BlockSpec(block_shape, index_map,
                                pipeline_mode=pl.Buffered(depth))
        except Exception:
            pass
    return pl.BlockSpec(block_shape, index_map)


# ---------------------------------------------------------------------------
# Wrapper
# ---------------------------------------------------------------------------
def vlm_feed_forward(hidden_states, w_gate, w_up, w_down, *,
                     tm=None, tn=None, weight_buffers=2):
    """SwiGLU feed-forward. hidden_states: [B, S, H] -> [B, S, H]."""
    B, S, H = hidden_states.shape
    Hg, I = w_gate.shape
    assert Hg == H and w_up.shape == (H, I) and w_down.shape == (I, H)

    dtype = hidden_states.dtype
    # MXU operands in the activation dtype (bf16 in production).
    if w_gate.dtype != dtype:
        w_gate = w_gate.astype(dtype)
    if w_up.dtype != dtype:
        w_up = w_up.astype(dtype)
    if w_down.dtype != dtype:
        w_down = w_down.astype(dtype)

    M = B * S
    x2d = hidden_states.reshape(M, H)

    x_bytes = jnp.dtype(dtype).itemsize
    # dtype-aware sublane alignment: 8 for f32, 16 for bf16, 32 for 8-bit types.
    align_m = max(8, 32 // x_bytes)

    vmem_cap = _vmem_capacity_bytes()
    small_vmem = vmem_cap <= 96 * 1024 * 1024      # v7x-class (64 MiB per TC)
    vmem_limit = int(vmem_cap * 0.8)               # leave headroom for Mosaic scratch

    auto_tm = tm is None
    auto_tn = tn is None
    if auto_tm:
        # Big token tiles amortize weight re-streaming (arithmetic intensity ~ tm).
        tm = _pick_tile(M, 384 if small_vmem else 512, align_m)
        # v7x has 2 TensorCores: keep >= 2 token tiles so both get work.
        if small_vmem and M > align_m and tm >= M:
            tm = max(align_m, _round_up(-(-M // 2), align_m))
    if auto_tn:
        tn = _pick_tile(I, 512 if small_vmem else 1024, 128)
    assert I % tn == 0, "intermediate dim must be a multiple of the I tile"

    # Shrink auto-picked tiles until the double-buffered blocks fit the VMEM budget.
    if auto_tm or auto_tn:
        budget = int(vmem_limit * 0.9)
        for _ in range(8):
            if _block_vmem_bytes(tm, tn, H, x_bytes, x_bytes) <= budget:
                break
            if auto_tn:
                new_tn = _pick_tile(I, max(128, tn // 2), 128)
                if new_tn < tn:
                    tn = new_tn
                    continue
            if auto_tm:
                new_tm = _pick_tile(M, max(align_m, tm // 2), align_m)
                if new_tm < tm:
                    tm = new_tm
                    continue
            break

    # Pad ragged token counts up to a multiple of the token tile (zero rows -> zero out).
    M_pad = pl.cdiv(M, tm) * tm
    if M_pad != M:
        x2d = jnp.pad(x2d, ((0, M_pad - M), (0, 0)))

    # Fuse gate/up per tn-chunk into one (H, 2*tn) weight stream.
    # NOTE: in a real model this fusion is done once at weight-load time, not per call.
    n_chunks = I // tn
    w_gu = jnp.concatenate(
        [w_gate.reshape(H, n_chunks, tn), w_up.reshape(H, n_chunks, tn)], axis=2
    ).reshape(H, 2 * I)

    grid = (M_pad // tm, n_chunks)
    n_token_tiles = M_pad // tm
    w_bytes = jnp.dtype(w_gu.dtype).itemsize
    cost = pl.CostEstimate(
        flops=6 * M_pad * H * I,           # three matmuls of 2*M*H*I FLOPs each
        transcendentals=M_pad * I,         # exp in SiLU
        bytes_accessed=(
            2 * M_pad * H * x_bytes                                 # x in, out
            + n_token_tiles * (w_gu.size + w_down.size) * w_bytes   # re-streamed weights
        ),
    )

    kernel = functools.partial(_ffn_kernel, tn=tn)
    out2d = pl.pallas_call(
        kernel,
        out_shape=jax.ShapeDtypeStruct((M_pad, H), dtype),
        grid_spec=pltpu.PrefetchScalarGridSpec(
            num_scalar_prefetch=0,
            grid=grid,
            in_specs=[
                pl.BlockSpec((tm, H), lambda i, j: (i, 0)),                 # x tile
                _weight_spec((H, 2 * tn), lambda i, j: (0, j), weight_buffers),  # [g|u]
                _weight_spec((tn, H), lambda i, j: (j, 0), weight_buffers),      # down
            ],
            out_specs=pl.BlockSpec((tm, H), lambda i, j: (i, 0)),
            scratch_shapes=[pltpu.VMEM((tm, H), jnp.float32)],
        ),
        compiler_params=pltpu.CompilerParams(
            dimension_semantics=("parallel", "arbitrary"),
            vmem_limit_bytes=vmem_limit,
        ),
        cost_estimate=cost,
    )(x2d, w_gu, w_down)

    if M_pad != M:
        out2d = out2d[:M]
    return out2d.reshape(B, S, H)


# ---------------------------------------------------------------------------
# Pure-JAX reference (same mixed precision as the kernel)
# ---------------------------------------------------------------------------
def _reference(hidden_states, w_gate, w_up, w_down, compute_dtype):
    H = hidden_states.shape[-1]
    x = hidden_states.astype(compute_dtype).reshape(-1, H)
    g = jnp.dot(x, w_gate.astype(compute_dtype), preferred_element_type=jnp.float32)
    u = jnp.dot(x, w_up.astype(compute_dtype), preferred_element_type=jnp.float32)
    h = u * (g * jax.nn.sigmoid(g))
    out = jnp.dot(h.astype(compute_dtype), w_down.astype(compute_dtype),
                  preferred_element_type=jnp.float32)
    return out.astype(hidden_states.dtype).reshape(hidden_states.shape)


if __name__ == "__main__":
    # Small shapes: batch=2, seq=8, hidden=128, intermediate=256
    B, S, H, I = 2, 8, 128, 256
    key = jax.random.PRNGKey(0)
    kx, kg, ku, kd = jax.random.split(key, 4)

    hidden_states = jax.random.normal(kx, (B, S, H), dtype=jnp.float32)
    w_gate = jax.random.normal(kg, (H, I), dtype=jnp.float32) * (1.0 / H ** 0.5)
    w_up = jax.random.normal(ku, (H, I), dtype=jnp.float32) * (1.0 / H ** 0.5)
    w_down = jax.random.normal(kd, (I, H), dtype=jnp.float32) * (1.0 / I ** 0.5)

    ref = _reference(hidden_states, w_gate, w_up, w_down, jnp.float32)

    # 1) f32 with explicit small tiles: exercises both grid axes (2 token tiles x
    #    2 I-chunks) including the first-chunk write / accumulate / finalize path.
    out = jax.block_until_ready(
        vlm_feed_forward(hidden_states, w_gate, w_up, w_down, tm=8, tn=128)
    )
    assert out.shape == (B, S, H), out.shape
    # Tolerance allows for the EUP approximate-reciprocal SiLU.
    assert jnp.allclose(out, ref, atol=5e-3, rtol=5e-3), float(
        jnp.max(jnp.abs(out - ref))
    )

    # 2) f32 with fully automatic (generation-aware) tile selection.
    out_auto = jax.block_until_ready(
        vlm_feed_forward(hidden_states, w_gate, w_up, w_down)
    )
    assert out_auto.shape == (B, S, H), out_auto.shape
    assert jnp.allclose(out_auto, ref, atol=5e-3, rtol=5e-3), float(
        jnp.max(jnp.abs(out_auto - ref))
    )

    # 3) bf16 production precision (bf16 MXU operands, f32 accumulation).
    xb = hidden_states.astype(jnp.bfloat16)
    wgb = w_gate.astype(jnp.bfloat16)
    wub = w_up.astype(jnp.bfloat16)
    wdb = w_down.astype(jnp.bfloat16)
    out_b = jax.block_until_ready(vlm_feed_forward(xb, wgb, wub, wdb, tm=16, tn=128))
    ref_b = _reference(xb, wgb, wub, wdb, jnp.bfloat16)
    assert out_b.shape == (B, S, H), out_b.shape
    diff = float(
        jnp.max(jnp.abs(out_b.astype(jnp.float32) - ref_b.astype(jnp.float32)))
    )
    assert diff < 5e-2, diff

    print("KERNEL_OK")
</pallas_src>

<mosaic_0001>
module attributes {stable_mosaic.version = 11 : i64} {
  func.func @_ffn_kernel(%arg0: i32, %arg1: i32, %arg2: memref<8x128xf32, #tpu.memory_space<vmem>>, %arg3: memref<128x256xf32, #tpu.memory_space<vmem>>, %arg4: memref<128x128xf32, #tpu.memory_space<vmem>>, %arg5: memref<8x128xf32, #tpu.memory_space<vmem>>, %arg6: memref<8x128xf32, #tpu.memory_space<vmem>>) attributes {dimension_semantics = [#tpu.dimension_semantics<parallel>, #tpu.dimension_semantics<arbitrary>], iteration_bounds = array<i64: 2, 2>, scalar_prefetch = 0 : i64, scratch_operands = 1 : i64, tpu.core_type = #tpu.core_type<tc>, window_params = [{transform_indices = @transform_0, window_bounds = array<i64: 8, 128>}, {transform_indices = @transform_1, window_bounds = array<i64: 128, 256>}, {transform_indices = @transform_2, window_bounds = array<i64: 128, 128>}, {transform_indices = @transform_3, window_bounds = array<i64: 8, 128>}]} {
    %c0 = arith.constant 0 : index
    %c0_0 = arith.constant 0 : index
    %0 = vector.load %arg2[%c0, %c0_0] : memref<8x128xf32, #tpu.memory_space<vmem>>, vector<8x128xf32>
    %c0_1 = arith.constant 0 : index
    %c0_2 = arith.constant 0 : index
    %1 = vector.load %arg3[%c0_1, %c0_2] : memref<128x256xf32, #tpu.memory_space<vmem>>, vector<128x256xf32>
    %cst = arith.constant dense<0.000000e+00> : vector<8x256xf32>
    %2 = tpu.matmul %0, %1, %cst {dimension_numbers = #tpu.dot_dimension_numbers<[1], [0], [0], [1], [0, 0, 1, 1], [], []>} : vector<8x128xf32>, vector<128x256xf32>, vector<8x256xf32> -> vector<8x256xf32>
    %3 = vector.extract_strided_slice %2 {offsets = [0, 0], sizes = [8, 128], strides = [1, 1]} : vector<8x256xf32> to vector<8x128xf32>
    %4 = vector.extract_strided_slice %2 {offsets = [0, 128], sizes = [8, 128], strides = [1, 1]} : vector<8x256xf32> to vector<8x128xf32>
    %cst_3 = arith.constant 0.000000e+00 : f32
    %5 = vector.broadcast %cst_3 : f32 to vector<8x128xf32>
    %6 = arith.subf %5, %3 : vector<8x128xf32>
    %7 = math.exp %6 : vector<8x128xf32>
    %cst_4 = arith.constant 1.000000e+00 : f32
    %8 = vector.broadcast %cst_4 : f32 to vector<8x128xf32>
    %9 = arith.addf %8, %7 : vector<8x128xf32>
    %10 = tpu.reciprocal %9 {approx = true} : vector<8x128xf32> -> vector<8x128xf32>
    %11 = arith.mulf %3, %10 : vector<8x128xf32>
    %12 = arith.mulf %4, %11 : vector<8x128xf32>
    %c0_5 = arith.constant 0 : index
    %c0_6 = arith.constant 0 : index
    %13 = vector.load %arg4[%c0_5, %c0_6] : memref<128x128xf32, #tpu.memory_space<vmem>>, vector<128x128xf32>
    %cst_7 = arith.constant dense<0.000000e+00> : vector<8x128xf32>
    %14 = tpu.matmul %12, %13, %cst_7 {dimension_numbers = #tpu.dot_dimension_numbers<[1], [0], [0], [1], [0, 0, 1, 1], [], []>} : vector<8x128xf32>, vector<128x128xf32>, vector<8x128xf32> -> vector<8x128xf32>
    %c0_i32 = arith.constant 0 : i32
    %15 = arith.cmpi eq, %arg1, %c0_i32 : i32
    %16 = arith.extui %15 : i1 to i32
    %c0_i32_8 = arith.constant 0 : i32
    %17 = arith.cmpi ne, %16, %c0_i32_8 : i32
    scf.if %17 {
      %c0_12 = arith.constant 0 : index
      %c0_13 = arith.constant 0 : index
      %24 = vector.load %arg6[%c0_12, %c0_13] : memref<8x128xf32, #tpu.memory_space<vmem>>, vector<8x128xf32>
      tpu.vector_store %arg6[%c0_12, %c0_13], %14 {strides = array<i32>} : memref<8x128xf32, #tpu.memory_space<vmem>>, vector<8x128xf32>,
    } else {
    }
    %c0_i32_9 = arith.constant 0 : i32
    %18 = arith.cmpi sgt, %arg1, %c0_i32_9 : i32
    %19 = arith.extui %18 : i1 to i32
    %c0_i32_10 = arith.constant 0 : i32
    %20 = arith.cmpi ne, %19, %c0_i32_10 : i32
    scf.if %20 {
      %c0_12 = arith.constant 0 : index
      %c0_13 = arith.constant 0 : index
      %24 = vector.load %arg6[%c0_12, %c0_13] : memref<8x128xf32, #tpu.memory_space<vmem>>, vector<8x128xf32>
      %25 = arith.addf %24, %14 : vector<8x128xf32>
      %c0_14 = arith.constant 0 : index
      %c0_15 = arith.constant 0 : index
      %26 = vector.load %arg6[%c0_14, %c0_15] : memref<8x128xf32, #tpu.memory_space<vmem>>, vector<8x128xf32>
      tpu.vector_store %arg6[%c0_14, %c0_15], %25 {strides = array<i32>} : memref<8x128xf32, #tpu.memory_space<vmem>>, vector<8x128xf32>,
    } else {
    }
    %c1_i32 = arith.constant 1 : i32
    %21 = arith.cmpi eq, %arg1, %c1_i32 : i32
    %22 = arith.extui %21 : i1 to i32
    %c0_i32_11 = arith.constant 0 : i32
    %23 = arith.cmpi ne, %22, %c0_i32_11 : i32
    scf.if %23 {
      %c0_12 = arith.constant 0 : index
      %c0_13 = arith.constant 0 : index
      %24 = vector.load %arg6[%c0_12, %c0_13] : memref<8x128xf32, #tpu.memory_space<vmem>>, vector<8x128xf32>
      %c0_14 = arith.constant 0 : index
      %c0_15 = arith.constant 0 : index
      %25 = vector.load %arg5[%c0_14, %c0_15] : memref<8x128xf32, #tpu.memory_space<vmem>>, vector<8x128xf32>
      tpu.vector_store %arg5[%c0_14, %c0_15], %24 {strides = array<i32>} : memref<8x128xf32, #tpu.memory_space<vmem>>, vector<8x128xf32>,
    } else {
    }
    return
  }
  func.func @transform_0(%arg0: i32, %arg1: i32) -> (i32, i32) {
    %c0_i32 = arith.constant 0 : i32
    %c0_i32_0 = arith.constant 0 : i32
    return %arg0, %c0_i32 : i32, i32
  }
  func.func @transform_1(%arg0: i32, %arg1: i32) -> (i32, i32) {
    %c0_i32 = arith.constant 0 : i32
    %c0_i32_0 = arith.constant 0 : i32
    return %c0_i32, %arg1 : i32, i32
  }
  func.func @transform_2(%arg0: i32, %arg1: i32) -> (i32, i32) {
    %c0_i32 = arith.constant 0 : i32
    %c0_i32_0 = arith.constant 0 : i32
    return %arg1, %c0_i32 : i32, i32
  }
  func.func @transform_3(%arg0: i32, %arg1: i32) -> (i32, i32) {
    %c0_i32 = arith.constant 0 : i32
    %c0_i32_0 = arith.constant 0 : i32
    return %arg0, %c0_i32 : i32, i32
  }
}

</mosaic_0001>

<bundles_post_ra>
// kernel: tpu_custom_call.1
= control target key start
LH: loop header
LB: loop body
LE: loop exit
PB: predicated region body
PF: predicated region fallthrough
CT: control target
= control target key end

     0   :  { %s1543_s0 = inlined_call_operand.hbm [shape: f32[16,128], index: 0, kind: input, shape index: {}]   ;;  %s1544_s1 = inlined_call_operand.hbm [shape: f32[128,512], index: 1, kind: input, shape index: {}]   ;;  %s1545_s2 = inlined_call_operand.hbm [shape: f32[256,128], index: 2, kind: input, shape index: {}]   ;;  %s1546_s3 = inlined_call_operand.hbm [shape: f32[16,128], index: 3, kind: output, shape index: {}]  }
   0x1   :  { %1558 = sst [smem:[#allocation19_spill]] %s1544_s1 }
   0x2   :  { %1559 = sst [smem:[#allocation20_spill]] %s1546_s3 }
   0x3   :  { %8 = vsyncpa [#allocation4], 0 }
   0x4   :  { %10 = vsyncpa [#allocation4 + $0x1], 0 }
   0x5   :  { %11 = vsyncpa [#allocation7], 0 }
   0x6   :  { %13 = vsyncpa [#allocation7 + $0x1], 0 }
   0x7   :  { %14 = vsyncpa [#allocation5], 0 }
   0x8   :  { %16 = vsyncpa [#allocation5 + $0x1], 0  ;;  %s1138_s12 = smov 0   ;;  %s1140_s13 = smov 0  }
   0x9   :  { %s1142_s14 = smov 0   ;;  %s1144_s15 = smov 0  }
   0xa   :  { %s1146_s16 = smov 0   ;;  %s1148_s17 = smov 0  }
   0xb   :  { %s1150_s18 = smov 0   ;;  %s1152_s19 = smov 0  }
   0xc   :  { %s1154_s20 = smov 0   ;;  %s1156_s21 = smov 0  }
   0xd   :  { %s1158_s22 = smov 0  }
   0xe LB: > { %1560 = sst [smem:[#allocation13_spill]] %s1084_s17  ;;  %p49_p0 = scmp.eq.s32.totalorder %s1104_s22, 0  ;;  %s1104_s22 = sphi %s1158_s22, %s22_s22   ;;  %s1100_s21 = sphi %s1156_s21, %s1590_s21   ;;  %s1096_s20 = sphi %s1154_s20, %s1597_s20   ;;  %s1092_s19 = sphi %s1152_s19, %s1588_s19   ;;  %s1088_s18 = sphi %s1150_s18, %s1596_s18   ;;  %s1084_s17 = sphi %s1148_s17, %s1587_s17   ;;  %s1080_s16 = sphi %s1146_s16, %s1595_s16   ;;  %s1076_s15 = sphi %s1144_s15, %s1594_s15   ;;  %s1072_s14 = sphi %s1142_s14, %s1593_s14   ;;  %s1068_s13 = sphi %s1140_s13, %s1592_s13   ;;  %s1064_s12 = sphi %s1138_s12, %s1591_s12  }
   0xf   : > { %1561 = sst [smem:[#allocation14_spill]] %s1100_s21  ;;  %s67_s23 = sadd.s32 1, %s1072_s14 }
  0x10   : > { %p74_p1 = scmp.ne.s32.totalorder %s1072_s14, %s1068_s13  ;;  %p1547_p2 = scmp.lt.s32.totalorder %s1104_s22, 4 }
  0x11   : > { %s174_s24 = sand.u32 1, %s1104_s22   ;;  %s1548_s25 = sand.u32 1, %s1072_s14  }
  0x12   : > { %p76_p3 = por %p74_p1, %p49_p0  ;;  %s654_s26 = sshll.u32 %s1096_s20, 8 }
  0x13   : > { %s636_s27 = sshll.u32 %s1548_s25, 8  ;;  %s1562_s1 = sld [smem:[#allocation19_spill]] }
  0x14   : > { %p1212_p4 = pnand %p1547_p2, %p76_p3  ;;  %s178_s5 = scalar_lea.vmem [#allocation6], %s636_s27 }
  0x15   : > { %s185_s6 = sshll.u32 %s178_s5, 4  ;;  %s1218_s7 = scalar_lea.sflag [#allocation7], %s174_s24  ;;  %s1216_s6 = int_to_ptr.vmem [resolvable:$true] %s185_s6 }
  0x16   : > { %p1549_p6 = pneg %p1212_p4 }
  0x19   : > { %s1208_s30 = scalar_lea.hbm %s1562_s1, %s654_s26  ;;  %s893_s11 = scalar_lea.hbm %s1562_s1, 8192 }
  0x1a   : > { %s888_s8 = scalar_lea.hbm %s1208_s30, 4096  ;;  %p894_p9 = scmp.lt.u32.totalorder %s1208_s30, %s1562_s1 }
  0x1b   : > { %p889_p5 = scmp.ne.s32.totalorder %s1208_s30, %s888_s8  ;;  %p895_p10 = scmp.lt.u32.totalorder %s893_s11, %s888_s8 }
  0x1c   : > { %p897_p12 = scmp.lt.u32.totalorder %s888_s8, %s1208_s30 }
  0x1d   : > { %p891_p7 = pnand %p1549_p6, %p889_p5  ;;  %p896_p11 = por %p895_p10, %p894_p9 }
  0x1f   : > { %p892_p8 = pneg %p891_p7  ;;  %p898_p13 = por %p897_p12, %p896_p11 }
  0x21   : > { %p899_p1 = pnand %p898_p13, %p892_p8 }
  0x23   : > { %902 = shalt.err (!%p899_p1)
}
  0x24   : > { %s903_s24 = scalar_lea.vmem %s1216_s6, 4096  ;;  %s1106_s27 = smov [#allocation6]  }
  0x25   : > { %p904_p3 = scmp.ne.s32.totalorder %s1216_s6, %s903_s24  ;;  %s908_s29 = sshll.u32 %s1106_s27, 4  ;;  %s909_s29 = int_to_ptr.vmem [resolvable:$false] %s908_s29 }
  0x26   : > { %s910_s5 = scalar_lea.vmem %s909_s29, 8192  ;;  %p911_p2 = scmp.lt.s32.totalorder %s1216_s6, %s909_s29 }
  0x27   : > { %p906_p5 = pnand %p904_p3, %p1549_p6  ;;  %p912_p9 = scmp.lt.s32.totalorder %s910_s5, %s903_s24 }
  0x29   : > { %p907_p7 = pneg %p906_p5  ;;  %p913_p10 = por %p912_p9, %p911_p2 }
  0x2b   : > { %p914_p11 = pnand %p913_p10, %p907_p7 }
  0x2d   : > { %917 = shalt.err (!%p914_p11)
}
  0x2e   : > { %s1107_s8 = smov 512   ;;  %s1108_s9 = smov 256  }
  0x2f   : > { %s1109_s10 = smov 16   ;;  %p642_p2 = scmp.ge.s32.totalorder %s1104_s22, 1 }
  0x30   : > { %778 = dma.hbm_to_vmem [thread:$0]  (!%p1212_p4), %s1208_s30, 4096, %s1216_s6, %s1218_s7, %s1107_s8, %s1108_s9, %s1109_s10  }
  0x31   : > { %p214_p8 = scmp.lt.s32.totalorder %s1104_s22, 5  ;;  %s1253_s26 = sadd.s32 4294967295, %s1104_s22  }
  0x32   : > { %s631_s28 = sadd.s32 4294967294, %s1104_s22   ;;  %s31_s24 = sadd.s32 1, %s1096_s20 }
  0x33   : > { %p1248_p12 = pnand %p642_p2, %p214_p8  ;;  %p32_p13 = scmp.ge.s32.totalorder %s31_s24, 2 }
  0x34   : > { %s34_s27 = sadd.s32 1, %s1100_s21  ;;  %s41_s30 = sadd.s32 1, %s1084_s17 }
  0x35   : > { %s1564_s11 = scalar_select %p1248_p12, 1, 0 }
  0x36   : > { %p48_p1 = scmp.ne.s32.totalorder %s1084_s17, %s1080_s16  ;;  %s1599_s24 = smov (%p32_p13, %s31_s24), 0 }
  0x37   : > { %1565 = sst [smem:[#allocation15_spill]] %s1599_s24  ;;  %s1601_s27 = smov (!%p32_p13, %s34_s27), %s1100_s21 }
  0x38   : > { %p1269_p3 = por %p49_p0, %p48_p1  ;;  %p54_p5 = scmp.ne.s32.totalorder %s1080_s16, %s1076_s15 }
  0x39   : > { %p36_p7 = scmp.ge.s32.totalorder %s1601_s27, 2  ;;  %p55_p9 = scmp.eq.s32.totalorder %s1253_s26, 0 }
  0x3a   : > { %s64_s29 = ssub.s32 %s1096_s20, %s1599_s24  ;;  %p80_p10 = scmp.ne.s32.totalorder %s1068_s13, %s1064_s12 }
  0x3b   : > { %s1603_s27 = smov (%p36_p7, %s1601_s27), 0  ;;  %p1285_p11 = por %p55_p9, %p54_p5 }
  0x3c   : > { %1567 = sst [smem:[#allocation16_spill]] %s1603_s27  ;;  %p65_p0 = scmp.eq.s32.totalorder %s64_s29, 0 }
  0x3d   : > { %s1568_s5 = scalar_select %p1285_p11, 1, 0 }
  0x3e   : > { %s38_s8 = ssub.s32 %s1100_s21, %s1603_s27  ;;  %p1291_p2 = por %p80_p10, %p55_p9 }
  0x3f   : > { %p39_p8 = scmp.eq.s32.totalorder %s38_s8, 0  ;;  %p130_p13 = scmp.eq.s32.totalorder %s1253_s26, 3 }
  0x40   : > { %s1569_s9 = scalar_select %p1291_p2, 1, 0 }
  0x41   : > { %s1299_s12 = scalar_select %p65_p0, %s1072_s14, %s67_s23  }
  0x42   : > { %s1302_s10 = scalar_select %p39_p8, %s1084_s17, %s41_s30  }
  0x43   : > { %1570 = sst [smem:[#allocation17_spill]] %s1299_s12  ;;  %p1307_p7 = por %p130_p13, %p48_p1 }
  0x44   : > { %1571 = sst [smem:[#allocation18_spill]] %s1302_s10  ;;  %p136_p6 = scmp.eq.s32.totalorder %s631_s28, 3 }
  0x45   : > { %s1572_s25 = scalar_select %p1307_p7, 1, 0 }
  0x46   : > { %s156_s29 = sand.u32 1, %s1084_s17   ;;  %s635_s1 = sshll.u32 %s1100_s21, 7 }
  0x47   : > { %p1316_p9 = por %p136_p6, %p54_p5  ;;  %s634_s8 = sshll.u32 %s156_s29, 3 }
  0x48   : > { %s1323_s23 = scalar_lea.hbm %s1543_s0, %s635_s1  ;;  %p1574_p10 = scmp.lt.s32.totalorder %s1104_s22, 4 }
  0x49   : > { %s1573_s27 = scalar_select %p1316_p9, 1, 0 }
  0x4a   : > { %p1329_p1 = pnand %p1574_p10, %p1269_p3  ;;  %s160_s30 = scalar_lea.vmem [#allocation3], %s634_s8 }
  0x4b   : > { %s167_s21 = sshll.u32 %s160_s30, 4  ;;  %s1576_s10 = sand.u32 1, %s1072_s14   ;;  %s1337_s21 = int_to_ptr.vmem [resolvable:$true] %s167_s21 }
  0x4c   : > { %s1335_s17 = sshll.u32 %s1576_s10, 7  ;;  %s157_s1 = scalar_lea.sflag [#allocation4], %s156_s29 }
  0x4d   : > { %s918_s3 = scalar_lea.hbm %s1323_s23, 128  ;;  %p920_p5 = pneg %p1329_p1 }
  0x4e   : > { %p919_p6 = scmp.ne.s32.totalorder %s1323_s23, %s918_s3  ;;  %s923_s12 = scalar_lea.hbm %s1543_s0, 256 }
  0x4f   : > { %p924_p8 = scmp.lt.u32.totalorder %s1323_s23, %s1543_s0  ;;  %p925_p13 = scmp.lt.u32.totalorder %s923_s12, %s918_s3 }
  0x50   : > { %p921_p3 = pnand %p920_p5, %p919_p6  ;;  %p927_p9 = scmp.lt.u32.totalorder %s918_s3, %s1323_s23 }
  0x51   : > { %p926_p10 = por %p925_p13, %p924_p8 }
  0x52   : > { %p922_p0 = pneg %p921_p3 }
  0x53   : > { %p928_p7 = por %p927_p9, %p926_p10 }
  0x55   : > { %p929_p2 = pnand %p928_p7, %p922_p0 }
  0x57   : > { %932 = shalt.err (!%p929_p2)
}
  0x58   : > { %s933_s10 = scalar_lea.vmem %s1337_s21, 128  ;;  %s1110_s29 = smov [#allocation3]  }
  0x59   : > { %p934_p6 = scmp.ne.s32.totalorder %s1337_s21, %s933_s10  ;;  %s938_s24 = sshll.u32 %s1110_s29, 4  ;;  %s939_s24 = int_to_ptr.vmem [resolvable:$false] %s938_s24 }
  0x5a   : > { %s940_s6 = scalar_lea.vmem %s939_s24, 256  ;;  %p941_p12 = scmp.lt.s32.totalorder %s1337_s21, %s939_s24 }
  0x5b   : > { %p936_p3 = pnand %p934_p6, %p920_p5  ;;  %p942_p8 = scmp.lt.s32.totalorder %s940_s6, %s933_s10 }
  0x5d   : > { %p937_p11 = pneg %p936_p3  ;;  %p943_p13 = por %p942_p8, %p941_p12 }
  0x5f   : > { %p944_p9 = pnand %p943_p13, %p937_p11 }
  0x61   : > { %947 = shalt.err (!%p944_p9)
}
  0x62   : > { %775 = dma.hbm_to_vmem [thread:$0]  (!%p1329_p1), %s1323_s23, 128, %s1337_s21, %s157_s1  }
  0x63   : > { %s655_s12 = sshll.u32 %s1096_s20, 11  ;;  %s199_s10 = scalar_lea.vmem [#allocation8], %s1335_s17 }
  0x64   : > { %s1368_s30 = scalar_lea.hbm %s1545_s2, %s655_s12  ;;  %s206_s29 = sshll.u32 %s199_s10, 4  ;;  %s1371_s29 = int_to_ptr.vmem [resolvable:$true] %s206_s29 }
  0x65   : > { %s948_s28 = scalar_lea.hbm %s1368_s30, 2048  ;;  %p1577_p11 = pneg %p1212_p4 }
  0x66   : > { %p949_p12 = scmp.ne.s32.totalorder %s1368_s30, %s948_s28  ;;  %s953_s1 = scalar_lea.hbm %s1545_s2, 4096 }
  0x67   : > { %p954_p1 = scmp.lt.u32.totalorder %s1368_s30, %s1545_s2  ;;  %p955_p5 = scmp.lt.u32.totalorder %s953_s1, %s948_s28 }
  0x68   : > { %p951_p2 = pnand %p949_p12, %p1577_p11  ;;  %p957_p10 = scmp.lt.u32.totalorder %s948_s28, %s1368_s30 }
  0x69   : > { %p956_p0 = por %p955_p5, %p954_p1 }
  0x6a   : > { %p952_p7 = pneg %p951_p2 }
  0x6b   : > { %p958_p6 = por %p957_p10, %p956_p0 }
  0x6d   : > { %p959_p3 = pnand %p958_p6, %p952_p7 }
  0x6f   : > { %962 = shalt.err (!%p959_p3)
}
  0x70   : > { %s963_s17 = scalar_lea.vmem %s1371_s29, 2048  ;;  %p1578_p13 = pmov %p1577_p11 }
  0x71   : > { %p964_p8 = scmp.ne.s32.totalorder %s1371_s29, %s963_s17  ;;  %s1111_s12 = smov [#allocation8]  }
  0x72   : > { %s968_s3 = sshll.u32 %s1111_s12, 4  ;;  %s969_s3 = int_to_ptr.vmem [resolvable:$false] %s968_s3 }
  0x73   : > { %p966_p9 = pnand %p964_p8, %p1578_p13  ;;  %s970_s8 = scalar_lea.vmem %s969_s3, 4096 }
  0x74   : > { %p971_p11 = scmp.lt.s32.totalorder %s1371_s29, %s969_s3  ;;  %p972_p2 = scmp.lt.s32.totalorder %s970_s8, %s963_s17 }
  0x75   : > { %p967_p12 = pneg %p966_p9 }
  0x76   : > { %p973_p1 = por %p972_p2, %p971_p11 }
  0x78   : > { %p974_p5 = pnand %p973_p1, %p967_p12 }
  0x7a   : > { %977 = shalt.err (!%p974_p5)
}
  0x7b   : > { %s1112_s10 = smov 128   ;;  %s1113_s28 = smov 8  }
  0x7c   : > { %781 = dma.hbm_to_vmem [thread:$0]  (!%p1212_p4), %s1368_s30, 2048, %s1371_s29, %s1218_s7, %s1112_s10, %s1112_s10, %s1113_s28  }
  0x7d   : > { %p1579_p7 = scmp.ne.s32.totalorder %s1564_s11, 0 }
  0x7e   : > { %s1400_s21 = sand.u32 (!%p1579_p7), 1, %s1080_s16   ;;  %p1580_p0 = scmp.ne.s32.totalorder (!%p1579_p7), %s1568_s5, 0 }
  0x7f   : > { %218 = sbr.rel (%p1579_p7) target bundleno = 677 (0x2a5), region = 32  ;;  %s643_s23 = sshll.u32 (!%p1579_p7), %s1400_s21, 3 }
  0x80   : > { %s221_s1 = scalar_lea.sflag (!%p1579_p7), [#allocation4], %s1400_s21  ;;  %s1406_s24 = scalar_lea.vmem (!%p1579_p7), [#allocation3], %s643_s23 }
  0x86   : > { %1051 = dma.done.wait (%p1580_p0), %s221_s1, 128  }
  0x87   : > { %1053 = vsyncadd (%p1580_p0), %s221_s1, 4294967168  ;;  %s229_s4 = sand.u32 1, %s1253_s26   ;;  %s231_s7 = sand.u32 1, %s1068_s13  }
  0x88   : > { %s644_s11 = sshll.u32 %s231_s7, 8  ;;  %s230_s30 = scalar_lea.sflag [#allocation7], %s229_s4 }
  0x89   : > { %s1416_s29 = scalar_lea.vmem [#allocation6], %s644_s11  ;;  %p1581_p4 = scmp.ne.s32.totalorder %s1569_s9, 0 }
  0x8b   : > { %1055 = dma.done.wait (%p1581_p4), %s230_s30, 6144  }
  0x8c   : > { %1057 = vsyncadd (%p1581_p4), %s230_s30, 4294961152  ;;  %v1114_v0 = vmov 0.0   ;;  %v279_v1 = vld [vmem:[%s1416_s29 + $0x8] sm:$0xff]  ;;  %v281_v2 = vld [vmem:[%s1416_s29 + $0x18] sm:$0xff]  ;;  %s645_s26 = sshll.u32 %s231_s7, 7  ;;  %v1115_v53 = vmov 0.0|0.0  }
  0x8d   : > { %374 = vmatprep.mubr.f32.mxu0 %v1114_v0  ;;  %v278_v3 = vld [vmem:[%s1416_s29] sm:$0xff]  ;;  %v708_v4 = vpack.c.bf16 %v281_v2, %v279_v1  ;;  %v280_v5 = vld [vmem:[%s1416_s29 + $0x10] sm:$0xff]  ;;  %v283_v6 = vld [vmem:[%s1416_s29 + $0x28] sm:$0xff]  ;;  %s1458_s5 = scalar_lea.vmem [#allocation8], %s645_s26  ;;  %740 = vmatprep.subr.bf16.mxu1 %v1115_v53  ;;  %vm1116_vm0 = vmmov 0   ;;  %s274_s9 = scalar_lea.vmem [#allocation9], %s643_s23 }
  0x8e   : > { %v285_v7 = vld [vmem:[%s1416_s29 + $0x38] sm:$0xff]  ;;  %v710_v8 = vpack.c.bf16 %v280_v5, %v278_v3  ;;  %v282_v10 = vld [vmem:[%s1416_s29 + $0x20] sm:$0xff]  ;;  %v284_v11 = vld [vmem:[%s1416_s29 + $0x30] sm:$0xff]  ;;  %705 = vmatprep.mubr.msk.f32.mxu1 %vm1116_vm0, %v1114_v0  ;;  %p647_p10 = scmp.ne.s32.totalorder %s1088_s18, 0 }
  0x8f   : > { %v712_v9 = vpack.c.bf16 %v285_v7, %v283_v6  ;;  %v287_v12 = vld [vmem:[%s1416_s29 + $0x48] sm:$0xff]  ;;  %709 = vmatprep.subr.bf16.mxu0 %v708_v4  ;;  %v289_v13 = vld [vmem:[%s1416_s29 + $0x58] sm:$0xff]  ;;  %v714_v14 = vpack.c.bf16 %v284_v11, %v282_v10  ;;  %v286_v16 = vld [vmem:[%s1416_s29 + $0x40] sm:$0xff] }
  0x90   : > { %711 = vmatpush1.bf16.msra.mxu0 %v710_v8  ;;  %v716_v15 = vpack.c.bf16 %v289_v13, %v287_v12  ;;  %v288_v17 = vld [vmem:[%s1416_s29 + $0x50] sm:$0xff]  ;;  %v291_v18 = vld [vmem:[%s1416_s29 + $0x68] sm:$0xff]  ;;  %v293_v19 = vld [vmem:[%s1416_s29 + $0x78] sm:$0xff] }
  0x91   : > { %713 = vmatprep.subr.bf16.mxu0 %v712_v9  ;;  %v718_v20 = vpack.c.bf16 %v288_v17, %v286_v16  ;;  %v720_v21 = vpack.c.bf16 %v293_v19, %v291_v18  ;;  %v290_v22 = vld [vmem:[%s1416_s29 + $0x60] sm:$0xff]  ;;  %v292_v23 = vld [vmem:[%s1416_s29 + $0x70] sm:$0xff]  ;;  %v295_v24 = vld [vmem:[%s1416_s29 + $0x88] sm:$0xff] }
  0x92   : > { %v297_v25 = vld [vmem:[%s1416_s29 + $0x98] sm:$0xff]  ;;  %v722_v26 = vpack.c.bf16 %v292_v23, %v290_v22  ;;  %v294_v28 = vld [vmem:[%s1416_s29 + $0x80] sm:$0xff]  ;;  %v296_v29 = vld [vmem:[%s1416_s29 + $0x90] sm:$0xff] }
  0x93   : > { %v724_v27 = vpack.c.bf16 %v297_v25, %v295_v24  ;;  %v299_v30 = vld [vmem:[%s1416_s29 + $0xa8] sm:$0xff]  ;;  %v301_v31 = vld [vmem:[%s1416_s29 + $0xb8] sm:$0xff]  ;;  %v726_v32 = vpack.c.bf16 %v296_v29, %v294_v28  ;;  %v298_v34 = vld [vmem:[%s1416_s29 + $0xa0] sm:$0xff] }
  0x94   : > { %715 = vmatpush1.bf16.msra.mxu0 %v714_v14  ;;  %v728_v33 = vpack.c.bf16 %v301_v31, %v299_v30  ;;  %v300_v35 = vld [vmem:[%s1416_s29 + $0xb0] sm:$0xff]  ;;  %v303_v36 = vld [vmem:[%s1416_s29 + $0xc8] sm:$0xff]  ;;  %v305_v37 = vld [vmem:[%s1416_s29 + $0xd8] sm:$0xff] }
  0x95   : > { %717 = vmatprep.subr.bf16.mxu0 %v716_v15  ;;  %v730_v38 = vpack.c.bf16 %v300_v35, %v298_v34  ;;  %v732_v39 = vpack.c.bf16 %v305_v37, %v303_v36  ;;  %v302_v40 = vld [vmem:[%s1416_s29 + $0xc0] sm:$0xff]  ;;  %v304_v41 = vld [vmem:[%s1416_s29 + $0xd0] sm:$0xff]  ;;  %v307_v42 = vld [vmem:[%s1416_s29 + $0xe8] sm:$0xff] }
  0x96   : > { %v309_v43 = vld [vmem:[%s1416_s29 + $0xf8] sm:$0xff]  ;;  %v734_v44 = vpack.c.bf16 %v304_v41, %v302_v40  ;;  %v306_v46 = vld [vmem:[%s1416_s29 + $0xe0] sm:$0xff]  ;;  %v308_v47 = vld [vmem:[%s1416_s29 + $0xf0] sm:$0xff] }
  0x97   : > { %v736_v45 = vpack.c.bf16 %v309_v43, %v307_v42  ;;  %v738_v48 = vpack.c.bf16 %v308_v47, %v306_v46  ;;  %v277_v49 = vld [vmem:[%s1406_s24] sm:$0xff]  ;;  %v388_v50 = vld [vmem:[%s1458_s5] sm:$0xff]  ;;  %v389_v51 = vld [vmem:[%s1458_s5 + $0x8] sm:$0xff] }
  0x98   : > { %719 = vmatpush1.bf16.msra.mxu0 %v718_v20  ;;  %v741_v52 = vpack.c.bf16 %v389_v51, %v388_v50  ;;  %v390_v54 = vld [vmem:[%s1458_s5 + $0x10] sm:$0xff]  ;;  %v391_v55 = vld [vmem:[%s1458_s5 + $0x18] sm:$0xff]  ;;  %v392_v57 = vld [vmem:[%s1458_s5 + $0x20] sm:$0xff] }
  0x99   : > { %721 = vmatprep.subr.bf16.mxu0 %v720_v21  ;;  %v744_v56 = vpack.c.bf16 %v391_v55, %v390_v54  ;;  %v393_v58 = vld [vmem:[%s1458_s5 + $0x28] sm:$0xff]  ;;  %v394_v60 = vld [vmem:[%s1458_s5 + $0x30] sm:$0xff]  ;;  %v395_v61 = vld [vmem:[%s1458_s5 + $0x38] sm:$0xff] }
  0x9a   : > { %742 = vmatpush3.bf16.msra.mxu1 %v741_v52  ;;  %v747_v59 = vpack.c.bf16 %v393_v58, %v392_v57  ;;  %v750_v62 = vpack.c.bf16 %v395_v61, %v394_v60  ;;  %v396_v63 = vld [vmem:[%s1458_s5 + $0x40] sm:$0xff]  ;;  %v397_v1 = vld [vmem:[%s1458_s5 + $0x48] sm:$0xff]  ;;  %v398_v3 = vld [vmem:[%s1458_s5 + $0x50] sm:$0xff] }
  0x9b   : > { %743 = vmatprep.subr.bf16.mxu1 %v1115_v53  ;;  %v753_v2 = vpack.c.bf16 %v397_v1, %v396_v63  ;;  %v399_v4 = vld [vmem:[%s1458_s5 + $0x58] sm:$0xff]  ;;  %v400_v6 = vld [vmem:[%s1458_s5 + $0x60] sm:$0xff]  ;;  %v401_v7 = vld [vmem:[%s1458_s5 + $0x68] sm:$0xff] }
  0x9c   : > { %723 = vmatpush1.bf16.msra.mxu0 %v722_v26  ;;  %v756_v5 = vpack.c.bf16 %v399_v4, %v398_v3  ;;  %v759_v8 = vpack.c.bf16 %v401_v7, %v400_v6  ;;  %v402_v9 = vld [vmem:[%s1458_s5 + $0x70] sm:$0xff]  ;;  %v403_v10 = vld [vmem:[%s1458_s5 + $0x78] sm:$0xff] }
  0x9d   : > { %725 = vmatprep.subr.bf16.mxu0 %v724_v27  ;;  %v762_v11 = vpack.c.bf16 %v403_v10, %v402_v9 }
  0x9e   : > { %745 = vmatpush3.bf16.msra.mxu1 %v744_v56 }
  0x9f   : > { %746 = vmatprep.subr.bf16.mxu1 %v1115_v53 }
  0xa0   : > { %727 = vmatpush1.bf16.msra.mxu0 %v726_v32 }
  0xa1   : > { %729 = vmatprep.subr.bf16.mxu0 %v728_v33 }
  0xa2   : > { %748 = vmatpush3.bf16.msra.mxu1 %v747_v59 }
  0xa3   : > { %749 = vmatprep.subr.bf16.mxu1 %v1115_v53 }
  0xa4   : > { %731 = vmatpush1.bf16.msra.mxu0 %v730_v38 }
  0xa5   : > { %733 = vmatprep.subr.bf16.mxu0 %v732_v39 }
  0xa6   : > { %751 = vmatpush3.bf16.msra.mxu1 %v750_v62 }
  0xa7   : > { %752 = vmatprep.subr.bf16.mxu1 %v1115_v53 }
  0xa8   : > { %735 = vmatpush1.bf16.msra.mxu0 %v734_v44 }
  0xa9   : > { %737 = vmatprep.subr.bf16.mxu0 %v736_v45 }
  0xaa   : > { %754 = vmatpush3.bf16.msra.mxu1 %v753_v2 }
  0xab   : > { %755 = vmatprep.subr.bf16.mxu1 %v1115_v53 }
  0xac   : > { %739 = vmatpush1.bf16.msra.mxu0 %v738_v48 }
  0xae   : > { %757 = vmatpush3.bf16.msra.mxu1 %v756_v5 }
  0xaf   : > { %375 = vmatmul.mubr.f32.vlgmr.msra.gmra.mrb[0].mxu0 %v277_v49  ;;  %758 = vmatprep.subr.bf16.mxu1 %v1115_v53 }
  0xb2   : > { %760 = vmatpush3.bf16.msra.mxu1 %v759_v8 }
  0xb3   : > { %761 = vmatprep.subr.bf16.mxu1 %v1115_v53 }
  0xb6   : > { %763 = vmatpush3.bf16.msra.mxu1 %v762_v11 }
 0x182   : > { %v376_v12 = vpop.f32.mrb[0].mxu0 }
 0x183   : > { %v381_v13 = vsub.f32 0.0, %v376_v12  ;;  %v378_v14 = vpop.f32.mrb[1].mxu0 }
 0x185   : > { %v382_v15 = vmul.f32 1.442695, %v381_v13 }
 0x187   : > { %884 = vpow2.f32 %v382_v15 }
 0x191   : > { %v885_v16 = vpop.eup %884 }
 0x192   : > { %v384_v17 = vadd.f32 1.0, %v885_v16 }
 0x194   : > { %886 = vrcp.f32 %v384_v17 }
 0x19e   : > { %v887_v18 = vpop.eup %886 }
 0x19f   : > { %v386_v19 = vmul.f32 %v887_v18, %v376_v12 }
 0x1a1   : > { %v387_v20 = vmul.f32 %v386_v19, %v378_v14 }
 0x1a3   : > { %706 = vmatmul.mubr.f32.vlgmr.msra.gmra.mrb[0].mxu1 %v387_v20 }
 0x271   : > { %477 = sbr.rel (%p647_p10) target bundleno = 632 (0x278), region = 48 }
 0x276   : > { %v470_v21 = vpop.f32.mrb[0].mxu1 }
 0x277   : > { %v707_v22 = vpop.f32.mrb[1].mxu1  ;;  %478 = vst [vmem:[#allocation2] sm:$0xff] (!%p647_p10), %v470_v21 }
 0x278 PF: > { %p648_p6 = scmp.le.s32.totalorder %s1088_s18, 0 }
 0x27a   : > { %482 = sbr.rel (%p648_p6) target bundleno = 642 (0x282), region = 52 }
 0x27e   : > { %v483_v0 = vld [vmem:[#allocation2] sm:$0xff] (!%p648_p6) }
 0x27f   : > { %v484_v23 = vadd.f32 (!%p648_p6), %v483_v0, %v470_v21 }
 0x281   : > { %485 = vst [vmem:[#allocation2] sm:$0xff] %v484_v23 }
 0x282 PF: > { %p649_p3 = scmp.ne.s32.totalorder %s1088_s18, 1 }
 0x284   : > { %489 = sbr.rel (%p649_p3) target bundleno = 651 (0x28b), region = 56 }
 0x288   : > { %v490_v24 = vld [vmem:[#allocation2] sm:$0xff] (!%p649_p3) }
 0x289   : > { %491 = vst [vmem:[%s274_s9] sm:$0xff] (!%p649_p3), %v490_v24 }
 0x28b PF: > { %s651_s6 = sshll.u32 %s1092_s19, 7  ;;  %s1582_s3 = sld [smem:[#allocation20_spill]] }
 0x28c   : > { %s506_s10 = sshll.u32 %s274_s9, 4  ;;  %s493_s28 = scalar_lea.sflag [#allocation5], %s1400_s21  ;;  %s507_s10 = int_to_ptr.vmem [resolvable:$true] %s506_s10 }
 0x28d   : > { %s978_s23 = scalar_lea.vmem %s507_s10, 128  ;;  %p1583_p13 = scmp.ne.s32.totalorder %s1572_s25, 0 }
 0x28e   : > { %p979_p8 = scmp.ne.s32.totalorder %s507_s10, %s978_s23  ;;  %s1117_s18 = smov [#allocation9]  }
 0x28f   : > { %s982_s1 = sshll.u32 %s1117_s18, 4  ;;  %s983_s1 = int_to_ptr.vmem [resolvable:$false] %s982_s1 }
 0x290   : > { %p980_p9 = pnand %p979_p8, %p1583_p13  ;;  %s984_s24 = scalar_lea.vmem %s983_s1, 256 }
 0x291   : > { %s1486_s8 = scalar_lea.hbm %s1582_s3, %s651_s6  ;;  %p985_p11 = scmp.lt.s32.totalorder %s507_s10, %s983_s1 }
 0x292   : > { %p981_p12 = pneg %p980_p9  ;;  %p986_p2 = scmp.lt.s32.totalorder %s984_s24, %s978_s23 }
 0x294   : > { %p987_p1 = por %p986_p2, %p985_p11 }
 0x296   : > { %p988_p5 = pnand %p987_p1, %p981_p12 }
 0x298   : > { %991 = shalt.err (!%p988_p5)
}
 0x299   : > { %s992_s19 = scalar_lea.hbm %s1486_s8, 128  ;;  %s996_s7 = scalar_lea.hbm %s1582_s3, 256 }
 0x29a   : > { %p993_p7 = scmp.ne.s32.totalorder %s1486_s8, %s992_s19  ;;  %p997_p10 = scmp.lt.u32.totalorder %s1486_s8, %s1582_s3 }
 0x29b   : > { %p998_p6 = scmp.lt.u32.totalorder %s996_s7, %s992_s19  ;;  %p1000_p8 = scmp.lt.u32.totalorder %s992_s19, %s1486_s8 }
 0x29c   : > { %p994_p0 = pnand %p993_p7, %p1583_p13 }
 0x29d   : > { %p999_p3 = por %p998_p6, %p997_p10 }
 0x29e   : > { %p995_p4 = pneg %p994_p0 }
 0x29f   : > { %p1001_p9 = por %p1000_p8, %p999_p3 }
 0x2a1   : > { %p1002_p12 = pnand %p1001_p9, %p995_p4 }
 0x2a3   : > { %1005 = shalt.err (!%p1002_p12)
}
 0x2a4   : > { %770 = dma.vmem_to_hbm [thread:$0]  (%p1583_p13), %s507_s10, 128, %s1486_s8, %s493_s28  }
 0x2a5 PF: > { %p787_p11 = scmp.ge.s32.totalorder %s1104_s22, 2  ;;  %s518_s29 = sand.u32 1, %s1076_s15  }
 0x2a6   : > { %p1584_p2 = scmp.ne.s32.totalorder %s1573_s27, 0  ;;  %s519_s26 = scalar_lea.sflag [#allocation5], %s518_s29 }
 0x2a8   : > { %p783_p1 = pnand %p787_p11, %p1584_p2 }
 0x2aa   : > { %1059 = dma.done.wait (!%p783_p1), %s519_s26, 128  }
 0x2ab   : > { %1061 = vsyncadd (!%p783_p1), %s519_s26, 4294967168  ;;  %s22_s22 = sadd.s32 1, %s1104_s22   ;;  %s1585_s5 = sld [smem:[#allocation17_spill]] }
 0x2ac   : > { %p19_p5 = scmp.ge.s32.totalorder %s22_s22, 6   ;;  %s1586_s25 = sld [smem:[#allocation13_spill]] }
 0x2ad   : > { %s1587_s17 = sld [smem:[#allocation18_spill]]  ;;  %s1588_s19 = sld [smem:[#allocation14_spill]] }
 0x2ae   : > { %s1589_s9 = sld [smem:[#allocation15_spill]]  ;;  %s1590_s21 = sld [smem:[#allocation16_spill]] }
 0x2af   : > { %s1591_s12 = smov %s1068_s13  ;;  %s1592_s13 = smov %s1072_s14 }
 0x2b0   : > { %s1594_s15 = smov %s1080_s16  ;;  %s1596_s18 = smov %s1096_s20 }
 0x2b1   : > { %s1593_s14 = smov %s1585_s5  ;;  %21 = sbr.rel (!%p19_p5) target bundleno = 14 (0xe), region = 113 }
 0x2b2   : > { %s1595_s16 = smov %s1586_s25 }
 0x2b4   : > { %s1597_s20 = smov %s1589_s9 }
 0x2b8   :  { %524 = vsyncpa [#allocation4], 1 }
 0x2b9   :  { %526 = vsyncpa [#allocation4 + $0x1], 1 }
 0x2ba   :  { %527 = vsyncpa [#allocation7], 1 }
 0x2bb   :  { %529 = vsyncpa [#allocation7 + $0x1], 1 }
 0x2bc   :  { %530 = vsyncpa [#allocation5], 1 }
 0x2bd   :  { %532 = vsyncpa [#allocation5 + $0x1], 1 }

</bundles_post_ra>
